<compile_context>
chip_gen: v7x
topology: tpu7x:2x2x1
jax: 0.10.0
libtpu: 0.0.40
codegen_flags: <defaults>
</compile_context>

<pallas_src>
import functools

import jax
import jax.numpy as jnp
from jax.experimental import pallas as pl
from jax.experimental.pallas import tpu as pltpu


# ------------------------------ kernel -------------------------------------

def _cls_head_max_kernel(x_ref, w_ref, b_ref, o_ref, acc_ref, *,
                         mask_last, valid_last):
    """x_ref: [TB, F, TP]   w_ref: [F, Cp]   b_ref: [1, Cp]
       o_ref: [TB, Cp]      acc_ref: [TB, F] f32 running max (scratch)."""
    p = pl.program_id(1)
    n_p = pl.num_programs(1)

    # Upcast for the compare (v5e has no bf16 VPU); HBM traffic is unaffected.
    xb = x_ref[...].astype(jnp.float32)
    if mask_last:
        # Only the last patch block can be partial: mask padded lanes to -inf
        # so they never win the max.
        tp = xb.shape[-1]
        lane = jax.lax.broadcasted_iota(jnp.int32, (1, 1, tp), 2)
        limit = jnp.where(p == n_p - 1, valid_last, tp)
        xb = jnp.where(lane < limit, xb, -jnp.inf)

    part = jnp.max(xb, axis=-1)                    # [TB, F] lane reduce

    @pl.when(p == 0)
    def _init():
        acc_ref[...] = part

    @pl.when(p > 0)
    def _accum():
        acc_ref[...] = jnp.maximum(acc_ref[...], part)

    @pl.when(p == n_p - 1)
    def _finalize():
        pooled = acc_ref[...]
        # TODO(synk): training-mode dropout not implemented (eval: identity).
        y = jnp.dot(pooled.astype(w_ref.dtype), w_ref[...],
                    preferred_element_type=jnp.float32)
        o_ref[...] = (y + b_ref[...]).astype(o_ref.dtype)


# --------------------------- sizing helpers ---------------------------------

def _vmem_capacity_bytes():
    try:
        return int(pltpu.get_tpu_info().vmem_capacity_bytes)
    except Exception:
        return 64 * 1024 * 1024  # conservative: v7x per-TC VMEM


def _pick_tiles(bs, P, F, Cp, x_bytes, w_bytes, budget_bytes, tb_cap):
    """Choose (TB, TP) with honest double-buffered VMEM accounting."""
    fixed = 2 * F * Cp * w_bytes + 2 * Cp * 4          # resident weight + bias
    avail = max(budget_bytes - fixed, budget_bytes // 4)

    def rows_that_fit(tp):
        # x double-buffer + output double-buffer + running-max scratch, per row.
        per_row = 2 * F * tp * x_bytes + 2 * Cp * 4 + F * 4
        return avail // per_row

    # Candidate patch tiles: whole P first, then shrinking multiples of 128.
    candidates = [P]
    tp128 = (min(P, 4096) // 128) * 128
    while tp128 >= 128:
        if tp128 < P:
            candidates.append(tp128)
        tp128 //= 2

    for tp in candidates:
        tb = min(rows_that_fit(tp), tb_cap, bs)
        if tb >= min(bs, 8):
            tb = bs if tb >= bs else (tb // 8) * 8
            return int(tb), int(tp)

    # Fallback: smallest legal tiles.
    return (bs if bs < 8 else 8), (P if P < 128 else 128)


# ----------------------------- wrappers -------------------------------------

def prepare_params(weight, bias, param_dtype=jnp.float32):
    """Hoisted out of the per-call path: pad/transpose the nn.Linear params
    once at model load. weight [n_classes, F] -> [F, Cp] (Cp = 128-multiple),
    bias [n_classes] -> [1, Cp] (f32)."""
    n_classes, F = weight.shape
    Cp = pl.cdiv(n_classes, 128) * 128
    w_t = jnp.zeros((F, Cp), param_dtype).at[:, :n_classes].set(
        weight.T.astype(param_dtype))
    b2 = jnp.zeros((1, Cp), jnp.float32).at[:, :n_classes].set(
        bias.astype(jnp.float32))
    return w_t, b2


def classification_head_max_prepared(x, w_t, b2, n_classes, patch_tile=None):
    """x: [bs, n_vars, d_model, num_patch] (f32 or bf16 — streamed as given)
       w_t: [F, Cp], b2: [1, Cp] from prepare_params. Returns [bs, n_classes] f32."""
    bs, n_vars, d_model, P = x.shape
    F, Cp = w_t.shape
    assert F == n_vars * d_model

    # Free relayout: n_vars/d_model are adjacent, so this flatten costs nothing
    # (no HBM transpose materialization). P stays on lanes; the kernel reduces it.
    x_fp = x.reshape(bs, F, P)

    x_bytes = jnp.dtype(x.dtype).itemsize
    w_bytes = jnp.dtype(w_t.dtype).itemsize

    vmem_cap = _vmem_capacity_bytes()
    budget = vmem_cap // 2                 # 64 MiB (v5e/v6e), 32 MiB (v7x)
    vmem_limit = (vmem_cap * 3) // 4       # 96 MiB (v5e/v6e), 48 MiB (v7x)

    tb_cap = 1024 if vmem_cap >= 96 * 1024 * 1024 else 256
    if bs >= 16:
        # Guarantee >= 2 grid blocks so both TensorCores get work (v7x megacore).
        half = -(-bs // 2)
        tb_cap = min(tb_cap, -(-half // 8) * 8)

    TB, TP = _pick_tiles(bs, P, F, Cp, x_bytes, w_bytes, budget, tb_cap)
    if patch_tile is not None:                       # test/tuning hook
        assert patch_tile == P or (patch_tile % 128 == 0 and patch_tile < P)
        TP = patch_tile

    mask_last = (P % TP) != 0
    kernel = functools.partial(_cls_head_max_kernel,
                               mask_last=mask_last,
                               valid_last=(P % TP) if mask_last else TP)

    grid = (pl.cdiv(bs, TB), pl.cdiv(P, TP))
    out = pl.pallas_call(
        kernel,
        out_shape=jax.ShapeDtypeStruct((bs, Cp), jnp.float32),
        grid=grid,
        in_specs=[
            # x: tiled over batch and patch axes (double-buffered pipeline).
            pl.BlockSpec((TB, F, TP), lambda i, p: (i, 0, p)),
            # weight / bias: constant block index -> fetched once, resident.
            pl.BlockSpec((F, Cp), lambda i, p: (0, 0)),
            pl.BlockSpec((1, Cp), lambda i, p: (0, 0)),
        ],
        out_specs=pl.BlockSpec((TB, Cp), lambda i, p: (i, 0)),
        scratch_shapes=[pltpu.VMEM((TB, F), jnp.float32)],
        compiler_params=pltpu.CompilerParams(
            dimension_semantics=("parallel", "arbitrary"),
            vmem_limit_bytes=int(vmem_limit),
        ),
    )(x_fp, w_t, b2)

    return out[:, :n_classes]


def classification_head_max(x, weight, bias):
    """Convenience entry matching the PyTorch module signature:
       weight [n_classes, F] (nn.Linear layout), bias [n_classes]."""
    param_dtype = jnp.bfloat16 if x.dtype == jnp.bfloat16 else jnp.float32
    w_t, b2 = prepare_params(weight, bias, param_dtype)
    return classification_head_max_prepared(x, w_t, b2, weight.shape[0])


# ----------------------------- reference ------------------------------------

def _reference(x, weight, bias):
    bs, n_vars, d_model, num_patch = x.shape
    x_flat = x.astype(jnp.float32).reshape(bs, n_vars * d_model, num_patch)
    pooled = jnp.max(x_flat, axis=-1)
    return pooled @ weight.T + bias


# ------------------------------- main ----------------------------------------

if __name__ == "__main__":
    key = jax.random.PRNGKey(0)

    # Primary small config consistent with the module's forward.
    bs, n_vars, d_model, num_patch, n_classes = 2, 4, 32, 8, 10
    feat = n_vars * d_model
    kx, kw, kb = jax.random.split(key, 3)
    x = jax.random.normal(kx, (bs, n_vars, d_model, num_patch), jnp.float32)
    weight = jax.random.normal(kw, (n_classes, feat), jnp.float32) * 0.05
    bias = jax.random.normal(kb, (n_classes,), jnp.float32) * 0.01

    # Hoisted parameter prep (done once, not per forward call).
    w_t, b2 = prepare_params(weight, bias, jnp.float32)
    fwd = jax.jit(functools.partial(classification_head_max_prepared,
                                    n_classes=n_classes))

    y = fwd(x, w_t, b2)
    jax.block_until_ready(y)
    y_ref = _reference(x, weight, bias)
    assert y.shape == (bs, n_classes)
    assert jnp.allclose(y, y_ref, atol=1e-5, rtol=1e-5), "mismatch vs reference"

    # All-negative input: guards against padded-region contamination of the max.
    x_neg = -jnp.abs(x) - 1.0
    y_neg = fwd(x_neg, w_t, b2)
    jax.block_until_ready(y_neg)
    assert jnp.allclose(y_neg, _reference(x_neg, weight, bias),
                        atol=1e-5, rtol=1e-5), "mismatch on all-negative input"

    # bf16-streamed path (halves HBM bytes; numerics differ -> loose tolerance).
    w_t16, b2_16 = prepare_params(weight, bias, jnp.bfloat16)
    y16 = fwd(x.astype(jnp.bfloat16), w_t16, b2_16)
    jax.block_until_ready(y16)
    assert jnp.allclose(y16, y_ref, atol=5e-2, rtol=5e-2), "bf16 path mismatch"

    # Partial last batch tile + >=2 grid blocks (two-TensorCore split on v7x).
    x2 = jax.random.normal(jax.random.PRNGKey(1),
                           (20, n_vars, d_model, num_patch), jnp.float32)
    y2 = fwd(x2, w_t, b2)
    jax.block_until_ready(y2)
    assert jnp.allclose(y2, _reference(x2, weight, bias),
                        atol=1e-5, rtol=1e-5), "partial-batch mismatch"

    # Forced patch tiling: multi-step P reduction + partial-lane masking path.
    n_vars3, d_model3, P3, n_cls3 = 2, 8, 160, 5
    kx3, kw3, kb3 = jax.random.split(jax.random.PRNGKey(2), 3)
    x3 = -jnp.abs(jax.random.normal(kx3, (2, n_vars3, d_model3, P3),
                                    jnp.float32)) - 1.0
    w3 = jax.random.normal(kw3, (n_cls3, n_vars3 * d_model3), jnp.float32) * 0.05
    b3 = jax.random.normal(kb3, (n_cls3,), jnp.float32) * 0.01
    w3_t, b3_2 = prepare_params(w3, b3, jnp.float32)
    y3 = classification_head_max_prepared(x3, w3_t, b3_2, n_cls3, patch_tile=128)
    jax.block_until_ready(y3)
    assert jnp.allclose(y3, _reference(x3, w3, b3),
                        atol=1e-5, rtol=1e-5), "patch-tiled path mismatch"

    print("KERNEL_OK")
</pallas_src>

<mosaic_0001>
module attributes {stable_mosaic.version = 11 : i64} {
  func.func @_cls_head_max_kernel(%arg0: i32, %arg1: i32, %arg2: memref<2x128x8xf32, #tpu.memory_space<vmem>>, %arg3: memref<128x128xf32, #tpu.memory_space<vmem>>, %arg4: memref<1x128xf32, #tpu.memory_space<vmem>>, %arg5: memref<2x128xf32, #tpu.memory_space<vmem>>, %arg6: memref<2x128xf32, #tpu.memory_space<vmem>>) attributes {dimension_semantics = [#tpu.dimension_semantics<parallel>, #tpu.dimension_semantics<arbitrary>], iteration_bounds = array<i64: 1, 1>, scalar_prefetch = 0 : i64, scratch_operands = 1 : i64, tpu.core_type = #tpu.core_type<tc>, window_params = [{transform_indices = @transform_0, window_bounds = array<i64: 2, 128, 8>}, {pipeline_mode = #tpu.pipeline_mode<synchronous>, transform_indices = @transform_1, window_bounds = array<i64: 128, 128>}, {pipeline_mode = #tpu.pipeline_mode<synchronous>, transform_indices = @transform_2, window_bounds = array<i64: 1, 128>}, {transform_indices = @transform_3, window_bounds = array<i64: 2, 128>}]} {
    %c0 = arith.constant 0 : index
    %c0_0 = arith.constant 0 : index
    %c0_1 = arith.constant 0 : index
    %0 = vector.load %arg2[%c0, %c0_0, %c0_1] : memref<2x128x8xf32, #tpu.memory_space<vmem>>, vector<2x128x8xf32>
    %cst = arith.constant dense<0xFF800000> : vector<2x128xf32>
    %1 = vector.multi_reduction <maximumf>, %0, %cst [2] : vector<2x128x8xf32> to vector<2x128xf32>
    %c0_i32 = arith.constant 0 : i32
    %2 = arith.cmpi eq, %arg1, %c0_i32 : i32
    %3 = arith.extui %2 : i1 to i32
    %c0_i32_2 = arith.constant 0 : i32
    %4 = arith.cmpi ne, %3, %c0_i32_2 : i32
    scf.if %4 {
      %c0_7 = arith.constant 0 : index
      %c0_8 = arith.constant 0 : index
      %11 = vector.load %arg6[%c0_7, %c0_8] : memref<2x128xf32, #tpu.memory_space<vmem>>, vector<2x128xf32>
      tpu.vector_store %arg6[%c0_7, %c0_8], %1 {strides = array<i32>} : memref<2x128xf32, #tpu.memory_space<vmem>>, vector<2x128xf32>,
    } else {
    }
    %c0_i32_3 = arith.constant 0 : i32
    %5 = arith.cmpi sgt, %arg1, %c0_i32_3 : i32
    %6 = arith.extui %5 : i1 to i32
    %c0_i32_4 = arith.constant 0 : i32
    %7 = arith.cmpi ne, %6, %c0_i32_4 : i32
    scf.if %7 {
      %c0_7 = arith.constant 0 : index
      %c0_8 = arith.constant 0 : index
      %11 = vector.load %arg6[%c0_7, %c0_8] : memref<2x128xf32, #tpu.memory_space<vmem>>, vector<2x128xf32>
      %12 = arith.maximumf %11, %1 : vector<2x128xf32>
      %c0_9 = arith.constant 0 : index
      %c0_10 = arith.constant 0 : index
      %13 = vector.load %arg6[%c0_9, %c0_10] : memref<2x128xf32, #tpu.memory_space<vmem>>, vector<2x128xf32>
      tpu.vector_store %arg6[%c0_9, %c0_10], %12 {strides = array<i32>} : memref<2x128xf32, #tpu.memory_space<vmem>>, vector<2x128xf32>,
    } else {
    }
    %c0_i32_5 = arith.constant 0 : i32
    %8 = arith.cmpi eq, %arg1, %c0_i32_5 : i32
    %9 = arith.extui %8 : i1 to i32
    %c0_i32_6 = arith.constant 0 : i32
    %10 = arith.cmpi ne, %9, %c0_i32_6 : i32
    scf.if %10 {
      %c0_7 = arith.constant 0 : index
      %c0_8 = arith.constant 0 : index
      %11 = vector.load %arg6[%c0_7, %c0_8] : memref<2x128xf32, #tpu.memory_space<vmem>>, vector<2x128xf32>
      %c0_9 = arith.constant 0 : index
      %c0_10 = arith.constant 0 : index
      %12 = vector.load %arg3[%c0_9, %c0_10] : memref<128x128xf32, #tpu.memory_space<vmem>>, vector<128x128xf32>
      %cst_11 = arith.constant dense<0.000000e+00> : vector<2x128xf32>
      %13 = tpu.matmul %11, %12, %cst_11 {dimension_numbers = #tpu.dot_dimension_numbers<[1], [0], [0], [1], [0, 0, 1, 1], [], []>} : vector<2x128xf32>, vector<128x128xf32>, vector<2x128xf32> -> vector<2x128xf32>
      %c0_12 = arith.constant 0 : index
      %c0_13 = arith.constant 0 : index
      %14 = vector.load %arg4[%c0_12, %c0_13] : memref<1x128xf32, #tpu.memory_space<vmem>>, vector<1x128xf32>
      %15 = vector.broadcast %14 : vector<1x128xf32> to vector<2x128xf32>
      %16 = arith.addf %13, %15 : vector<2x128xf32>
      %c0_14 = arith.constant 0 : index
      %c0_15 = arith.constant 0 : index
      %17 = vector.load %arg5[%c0_14, %c0_15] : memref<2x128xf32, #tpu.memory_space<vmem>>, vector<2x128xf32>
      tpu.vector_store %arg5[%c0_14, %c0_15], %16 {strides = array<i32>} : memref<2x128xf32, #tpu.memory_space<vmem>>, vector<2x128xf32>,
    } else {
    }
    return
  }
  func.func @transform_0(%arg0: i32, %arg1: i32) -> (i32, i32, i32) {
    %c0_i32 = arith.constant 0 : i32
    %c0_i32_0 = arith.constant 0 : i32
    return %arg0, %c0_i32, %arg1 : i32, i32, i32
  }
  func.func @transform_1(%arg0: i32, %arg1: i32) -> (i32, i32) {
    %c0_i32 = arith.constant 0 : i32
    %c0_i32_0 = arith.constant 0 : i32
    %c0_i32_1 = arith.constant 0 : i32
    return %c0_i32, %c0_i32_0 : i32, i32
  }
  func.func @transform_2(%arg0: i32, %arg1: i32) -> (i32, i32) {
    %c0_i32 = arith.constant 0 : i32
    %c0_i32_0 = arith.constant 0 : i32
    %c0_i32_1 = arith.constant 0 : i32
    return %c0_i32, %c0_i32_0 : i32, i32
  }
  func.func @transform_3(%arg0: i32, %arg1: i32) -> (i32, i32) {
    %c0_i32 = arith.constant 0 : i32
    %c0_i32_0 = arith.constant 0 : i32
    return %arg0, %c0_i32 : i32, i32
  }
}

</mosaic_0001>

<bundles_post_ra>
// kernel: classification_head_max_prepared.1
= control target key start
LH: loop header
LB: loop body
LE: loop exit
PB: predicated region body
PF: predicated region fallthrough
CT: control target
= control target key end

     0   :  { %vm47_vm0 = vcmask 64512   ;;  %s1168_s0 = inlined_call_operand.vmem [shape: f32[2,128,8], index: 0, kind: input, shape index: {}]   ;;  %s1169_s1 = inlined_call_operand.vmem [shape: f32[128,128], index: 1, kind: input, shape index: {}]   ;;  %s1170_s2 = inlined_call_operand.vmem [shape: f32[1,128], index: 2, kind: input, shape index: {}]   ;;  %s1171_s3 = inlined_call_operand.hbm [shape: f32[2,128], index: 3, kind: output, shape index: {}]  }
   0x1   :  { %v31_v0 = vld [vmem:[%s1168_s0 + $0x80] sm:$0xff]  ;;  %v32_v2 = vld [vmem:[%s1168_s0 + $0x88] sm:$0xff]  ;;  %v33_v8 = vld [vmem:[%s1168_s0 + $0x90] sm:$0xff] }
   0x2   :  { %v15_v1 = vld [vmem:[%s1168_s0] sm:$0xff]  ;;  %v96_v3 = vsel %vm47_vm0, %v31_v0, -inf  ;;  %v16_v5 = vld [vmem:[%s1168_s0 + $0x8] sm:$0xff]  ;;  %v99_v6 = vsel %vm47_vm0, %v32_v2, -inf  ;;  %v17_v9 = vld [vmem:[%s1168_s0 + $0x10] sm:$0xff]  ;;  %v102_v10 = vsel %vm47_vm0, %v33_v8, -inf }
   0x3   :  { %v48_v4 = vsel %vm47_vm0, %v15_v1, -inf  ;;  %97 = vmax.xlane.f32.xlu1 %v96_v3  ;;  %v51_v7 = vsel %vm47_vm0, %v16_v5, -inf  ;;  %v54_v11 = vsel %vm47_vm0, %v17_v9, -inf  ;;  %v34_v12 = vld [vmem:[%s1168_s0 + $0x98] sm:$0xff] }
   0x4   :  { %49 = vmax.xlane.f32.xlu0 %v48_v4  ;;  %v18_v13 = vld [vmem:[%s1168_s0 + $0x18] sm:$0xff]  ;;  %v105_v14 = vsel %vm47_vm0, %v34_v12, -inf }
   0x5   :  { %v57_v15 = vsel %vm47_vm0, %v18_v13, -inf }
   0x7   :  { %100 = vmax.xlane.f32.xlu1 %v99_v6 }
   0x8   :  { %52 = vmax.xlane.f32.xlu0 %v51_v7 }
   0xb   :  { %103 = vmax.xlane.f32.xlu1 %v102_v10 }
   0xc   :  { %55 = vmax.xlane.f32.xlu0 %v54_v11 }
   0xd   :  { %8 = vsyncpa [#allocation4], 0  ;;  %v35_v16 = vld [vmem:[%s1168_s0 + $0xa0] sm:$0xff]  ;;  %v36_v20 = vld [vmem:[%s1168_s0 + $0xa8] sm:$0xff]  ;;  %v823_v1 = vmov 0.0|0.0   ;;  %vm824_vm1 = vmmov 0  }
   0xe   :  { %v19_v17 = vld [vmem:[%s1168_s0 + $0x20] sm:$0xff]  ;;  %v108_v18 = vsel %vm47_vm0, %v35_v16, -inf  ;;  %v20_v21 = vld [vmem:[%s1168_s0 + $0x28] sm:$0xff]  ;;  %v111_v22 = vsel %vm47_vm0, %v36_v20, -inf  ;;  %v37_v24 = vld [vmem:[%s1168_s0 + $0xb0] sm:$0xff]  ;;  %771 = vmatprep.subr.bf16.mxu0 %v823_v1  ;;  %vm191_vm2 = vcmask 130112  }
   0xf   :  { %106 = vmax.xlane.f32.xlu1 %v105_v14  ;;  %v60_v19 = vsel %vm47_vm0, %v19_v17, -inf  ;;  %v63_v23 = vsel %vm47_vm0, %v20_v21, -inf  ;;  %v21_v25 = vld [vmem:[%s1168_s0 + $0x30] sm:$0xff]  ;;  %v114_v26 = vsel %vm47_vm0, %v37_v24, -inf  ;;  %v38_v28 = vld [vmem:[%s1168_s0 + $0xb8] sm:$0xff]  ;;  %v39_v32 = vld [vmem:[%s1168_s0 + $0xc0] sm:$0xff] }
  0x10   :  { %58 = vmax.xlane.f32.xlu0 %v57_v15  ;;  %v66_v27 = vsel %vm47_vm0, %v21_v25, -inf  ;;  %v22_v29 = vld [vmem:[%s1168_s0 + $0x38] sm:$0xff]  ;;  %v117_v30 = vsel %vm47_vm0, %v38_v28, -inf  ;;  %v23_v33 = vld [vmem:[%s1168_s0 + $0x40] sm:$0xff]  ;;  %v120_v34 = vsel %vm47_vm0, %v39_v32, -inf  ;;  %v40_v36 = vld [vmem:[%s1168_s0 + $0xc8] sm:$0xff] }
  0x11   :  { %v69_v31 = vsel %vm47_vm0, %v22_v29, -inf  ;;  %v72_v35 = vsel %vm47_vm0, %v23_v33, -inf  ;;  %v24_v37 = vld [vmem:[%s1168_s0 + $0x48] sm:$0xff]  ;;  %v123_v38 = vsel %vm47_vm0, %v40_v36, -inf  ;;  %v41_v40 = vld [vmem:[%s1168_s0 + $0xd0] sm:$0xff]  ;;  %v42_v44 = vld [vmem:[%s1168_s0 + $0xd8] sm:$0xff] }
  0x12   :  { %v75_v39 = vsel %vm47_vm0, %v24_v37, -inf  ;;  %v25_v41 = vld [vmem:[%s1168_s0 + $0x50] sm:$0xff]  ;;  %v126_v42 = vsel %vm47_vm0, %v41_v40, -inf  ;;  %v26_v45 = vld [vmem:[%s1168_s0 + $0x58] sm:$0xff]  ;;  %v129_v46 = vsel %vm47_vm0, %v42_v44, -inf  ;;  %v43_v48 = vld [vmem:[%s1168_s0 + $0xe0] sm:$0xff] }
  0x13   :  { %109 = vmax.xlane.f32.xlu1 %v108_v18  ;;  %v78_v43 = vsel %vm47_vm0, %v25_v41, -inf  ;;  %v81_v47 = vsel %vm47_vm0, %v26_v45, -inf  ;;  %v27_v49 = vld [vmem:[%s1168_s0 + $0x60] sm:$0xff]  ;;  %v132_v50 = vsel %vm47_vm0, %v43_v48, -inf  ;;  %v44_v52 = vld [vmem:[%s1168_s0 + $0xe8] sm:$0xff]  ;;  %v45_v56 = vld [vmem:[%s1168_s0 + $0xf0] sm:$0xff] }
  0x14   :  { %61 = vmax.xlane.f32.xlu0 %v60_v19  ;;  %v84_v51 = vsel %vm47_vm0, %v27_v49, -inf  ;;  %v28_v53 = vld [vmem:[%s1168_s0 + $0x68] sm:$0xff]  ;;  %v135_v54 = vsel %vm47_vm0, %v44_v52, -inf  ;;  %v29_v57 = vld [vmem:[%s1168_s0 + $0x70] sm:$0xff]  ;;  %v610_v58 = vld [vmem:[%s1169_s1] sm:$0xff]  ;;  %v138_v60 = vsel %vm47_vm0, %v45_v56, -inf }
  0x15   :  { %v87_v55 = vsel %vm47_vm0, %v28_v53, -inf  ;;  %v611_v59 = vld [vmem:[%s1169_s1 + $0x8] sm:$0xff]  ;;  %v90_v61 = vsel %vm47_vm0, %v29_v57, -inf  ;;  %v46_v63 = vld [vmem:[%s1168_s0 + $0xf8] sm:$0xff]  ;;  %v612_v2 = vld [vmem:[%s1169_s1 + $0x10] sm:$0xff]  ;;  %v825_v25 = vmov 0.0  }
  0x16   :  { %v772_v62 = vpack.c.bf16 %v611_v59, %v610_v58  ;;  %v30_v0 = vld [vmem:[%s1168_s0 + $0x78] sm:$0xff]  ;;  %v141_v4 = vsel %vm47_vm0, %v46_v63, -inf  ;;  %v614_v7 = vld [vmem:[%s1169_s1 + $0x20] sm:$0xff]  ;;  %v615_v8 = vld [vmem:[%s1169_s1 + $0x28] sm:$0xff]  ;;  %768 = vmatprep.mubr.msk.f32.mxu0 %vm824_vm1, %v825_v25  ;;  %vm198_vm3 = vcmask 195712   ;;  %vm205_vm4 = vcmask 261312  }
  0x17   :  { %112 = vmax.xlane.f32.xlu1 %v111_v22  ;;  %v613_v3 = vld [vmem:[%s1169_s1 + $0x18] sm:$0xff]  ;;  %v93_v5 = vsel %vm47_vm0, %v30_v0, -inf  ;;  %v778_v9 = vpack.c.bf16 %v615_v8, %v614_v7  ;;  %v616_v10 = vld [vmem:[%s1169_s1 + $0x30] sm:$0xff]  ;;  %v618_v13 = vld [vmem:[%s1169_s1 + $0x40] sm:$0xff]  ;;  %vm212_vm5 = vcmask 326912   ;;  %vm219_vm6 = vcmask 392512  }
  0x18   :  { %64 = vmax.xlane.f32.xlu0 %v63_v23  ;;  %773 = vmatpush3.bf16.msra.mxu0 %v772_v62  ;;  %v775_v6 = vpack.c.bf16 %v613_v3, %v612_v2  ;;  %v617_v11 = vld [vmem:[%s1169_s1 + $0x38] sm:$0xff]  ;;  %v619_v14 = vld [vmem:[%s1169_s1 + $0x48] sm:$0xff]  ;;  %v620_v16 = vld [vmem:[%s1169_s1 + $0x50] sm:$0xff]  ;;  %vm226_vm7 = vcmask 458112   ;;  %vm233_vm8 = vcmask 523712   ;;  %vm240_vm9 = vcmask 589312  }
  0x19   :  { %774 = vmatprep.subr.bf16.mxu0 %v823_v1  ;;  %v781_v12 = vpack.c.bf16 %v617_v11, %v616_v10  ;;  %v784_v15 = vpack.c.bf16 %v619_v14, %v618_v13  ;;  %v621_v17 = vld [vmem:[%s1169_s1 + $0x58] sm:$0xff]  ;;  %v622_v19 = vld [vmem:[%s1169_s1 + $0x60] sm:$0xff]  ;;  %v623_v20 = vld [vmem:[%s1169_s1 + $0x68] sm:$0xff]  ;;  %vm247_vm10 = vcmask 654912   ;;  %vm254_vm11 = vcmask 720512   ;;  %s826_s27 = smov [#allocation3]  }
  0x1a   :  { %v787_v18 = vpack.c.bf16 %v621_v17, %v620_v16  ;;  %v790_v21 = vpack.c.bf16 %v623_v20, %v622_v19  ;;  %v624_v22 = vld [vmem:[%s1169_s1 + $0x70] sm:$0xff]  ;;  %v625_v23 = vld [vmem:[%s1169_s1 + $0x78] sm:$0xff]  ;;  %vm261_vm12 = vcmask 786112   ;;  %vm268_vm13 = vcmask 851712   ;;  %s710_s28 = sshll.u32 %s826_s27, 4  ;;  %s711_s28 = int_to_ptr.vmem [resolvable:$true] %s710_s28 }
  0x1b   :  { %115 = vmax.xlane.f32.xlu1 %v114_v26  ;;  %v793_v24 = vpack.c.bf16 %v625_v23, %v624_v22  ;;  %vm275_vm14 = vcmask 917312   ;;  %vm282_vm15 = vcmask 982912   ;;  %vm289_vm0 = vcmask 1048512   ;;  %s799_s29 = scalar_lea.vmem %s711_s28, 32  ;;  %p804_p1 = scmp.lt.s32.totalorder %s711_s28, %s711_s28 }
  0x1c   :  { %67 = vmax.xlane.f32.xlu0 %v66_v27  ;;  %776 = vmatpush3.bf16.msra.mxu0 %v775_v6  ;;  %vm370_vm1 = vcmask 1041409   ;;  %p800_p0 = scmp.ne.s32.totalorder %s711_s28, %s799_s29  ;;  %p805_p2 = scmp.lt.s32.totalorder %s799_s29, %s799_s29 }
  0x1d   :  { %777 = vmatprep.subr.bf16.mxu0 %v823_v1 }
  0x1e   :  { %p806_p3 = por %p805_p2, %p804_p1 }
  0x1f   :  { %118 = vmax.xlane.f32.xlu1 %v117_v30 }
  0x20   :  { %70 = vmax.xlane.f32.xlu0 %v69_v31  ;;  %779 = vmatpush3.bf16.msra.mxu0 %v778_v9  ;;  %p807_p4 = pnand %p806_p3, %p800_p0 }
  0x21   :  { %780 = vmatprep.subr.bf16.mxu0 %v823_v1 }
  0x23   :  { %121 = vmax.xlane.f32.xlu1 %v120_v34 }
  0x24   :  { %73 = vmax.xlane.f32.xlu0 %v72_v35  ;;  %782 = vmatpush3.bf16.msra.mxu0 %v781_v12 }
  0x25   :  { %783 = vmatprep.subr.bf16.mxu0 %v823_v1 }
  0x27   :  { %124 = vmax.xlane.f32.xlu1 %v123_v38 }
  0x28   :  { %76 = vmax.xlane.f32.xlu0 %v75_v39  ;;  %785 = vmatpush3.bf16.msra.mxu0 %v784_v15 }
  0x29   :  { %786 = vmatprep.subr.bf16.mxu0 %v823_v1 }
  0x2b   :  { %127 = vmax.xlane.f32.xlu1 %v126_v42  ;;  %v180_v42 = vlaneseq }
  0x2c   :  { %79 = vmax.xlane.f32.xlu0 %v78_v43  ;;  %788 = vmatpush3.bf16.msra.mxu0 %v787_v18 }
  0x2d   :  { %789 = vmatprep.subr.bf16.mxu0 %v823_v1  ;;  %v181_v45 = vand.u32 127, %v180_v42 }
  0x2f   :  { %130 = vmax.xlane.f32.xlu1 %v129_v46  ;;  %v183_v46 = vshrl.u32 %v180_v42, 7  ;;  %v193_v48 = vadd.s32 4294967280, %v181_v45  ;;  %v200_v49 = vadd.s32 4294967272, %v181_v45  ;;  %v207_v52 = vadd.s32 4294967264, %v181_v45 }
  0x30   :  { %82 = vmax.xlane.f32.xlu0 %v81_v47  ;;  %791 = vmatpush3.bf16.msra.mxu0 %v790_v21  ;;  %v186_v47 = vadd.s32 4294967288, %v181_v45  ;;  %v221_v57 = vadd.s32 4294967248, %v181_v45  ;;  %v228_v58 = vadd.s32 4294967240, %v181_v45  ;;  %v256_v2 = vadd.s32 4294967208, %v181_v45 }
  0x31   :  { %792 = vmatprep.subr.bf16.mxu0 %v823_v1  ;;  %v184_v53 = vsub.s32 %v181_v45, %v183_v46  ;;  %v196_v56 = vsub.s32 %v193_v48, %v183_v46  ;;  %v203_v59 = vsub.s32 %v200_v49, %v183_v46  ;;  %v210_v0 = vsub.s32 %v207_v52, %v183_v46 }
  0x32   :  { %v249_v1 = vadd.s32 4294967216, %v181_v45  ;;  %v224_v6 = vsub.s32 %v221_v57, %v183_v46  ;;  %v231_v7 = vsub.s32 %v228_v58, %v183_v46  ;;  %v277_v12 = vadd.s32 4294967184, %v181_v45 }
  0x33   :  { %133 = vmax.xlane.f32.xlu1 %v132_v50  ;;  %v284_v13 = vadd.s32 4294967176, %v181_v45  ;;  %v1079_v17 = vsub.s32 %v256_v2, %v183_v46 }
  0x34   :  { %85 = vmax.xlane.f32.xlu0 %v84_v51  ;;  %794 = vmatpush3.bf16.msra.mxu0 %v793_v24  ;;  %v1077_v16 = vsub.s32 %v249_v1, %v183_v46  ;;  %v1093_v42 = vsub.s32 %v277_v12, %v183_v46 }
  0x37   :  { %136 = vmax.xlane.f32.xlu1 %v135_v54  ;;  %v214_v54 = vadd.s32 4294967256, %v181_v45 }
  0x38   :  { %88 = vmax.xlane.f32.xlu0 %v87_v55  ;;  %v189_v55 = vsub.s32 %v186_v47, %v183_v46 }
  0x39   :  { %v217_v3 = vsub.s32 %v214_v54, %v183_v46 }
  0x3b   :  { %139 = vmax.xlane.f32.xlu1 %v138_v60  ;;  %v235_v60 = vadd.s32 4294967232, %v181_v45 }
  0x3c   :  { %91 = vmax.xlane.f32.xlu0 %v90_v61  ;;  %v242_v61 = vadd.s32 4294967224, %v181_v45 }
  0x3d   :  { %v1067_v8 = vsub.s32 %v235_v60, %v183_v46 }
  0x3e   :  { %v1069_v9 = vsub.s32 %v242_v61, %v183_v46 }
  0x3f   :  { %142 = vmax.xlane.f32.xlu1 %v141_v4  ;;  %v263_v4 = vadd.s32 4294967200, %v181_v45 }
  0x40   :  { %94 = vmax.xlane.f32.xlu0 %v93_v5  ;;  %v270_v5 = vadd.s32 4294967192, %v181_v45  ;;  %v1095_v45 = vsub.s32 %v284_v13, %v183_v46 }
  0x41   :  { %v1083_v20 = vsub.s32 %v263_v4, %v183_v46 }
  0x42   :  { %v1085_v21 = vsub.s32 %v270_v5, %v183_v46 }
  0x90   :  { %v1023_v26 = vpop.xlane.xlu1 %97 }
  0x91   :  { %v1025_v27 = vpop.xlane.xlu0 %49  ;;  %v294_v22 = vrot.slane %v1023_v26, %v184_v53 }
  0x92   :  { %v185_v23 = vrot.slane %v1025_v27, %v184_v53 }
  0x94   :  { %v1027_v28 = vpop.xlane.xlu1 %100 }
  0x95   :  { %v1029_v29 = vpop.xlane.xlu0 %52  ;;  %v298_v14 = vrot.slane %v1027_v28, %v189_v55 }
  0x96   :  { %v190_v15 = vrot.slane %v1029_v29, %v189_v55 }
  0x97   :  { %v299_v26 = vsel %vm191_vm2, %v298_v14, %v294_v22 }
  0x98   :  { %v1031_v30 = vpop.xlane.xlu1 %103  ;;  %v192_v27 = vsel %vm191_vm2, %v190_v15, %v185_v23 }
  0x99   :  { %v1033_v31 = vpop.xlane.xlu0 %55  ;;  %v303_v18 = vrot.slane %v1031_v30, %v196_v56 }
  0x9a   :  { %v197_v19 = vrot.slane %v1033_v31, %v196_v56 }
  0x9c   :  { %v1035_v32 = vpop.xlane.xlu1 %106 }
  0x9d   :  { %v1037_v33 = vpop.xlane.xlu0 %58  ;;  %v308_v24 = vrot.slane %v1035_v32, %v203_v59 }
  0x9e   :  { %v204_v25 = vrot.slane %v1037_v33, %v203_v59 }
  0xa0   :  { %v1039_v34 = vpop.xlane.xlu1 %109 }
  0xa1   :  { %v1041_v35 = vpop.xlane.xlu0 %61  ;;  %v313_v28 = vrot.slane %v1039_v34, %v210_v0  ;;  %v304_v34 = vsel %vm198_vm3, %v303_v18, %v299_v26 }
  0xa2   :  { %v211_v29 = vrot.slane %v1041_v35, %v210_v0  ;;  %v199_v35 = vsel %vm198_vm3, %v197_v19, %v192_v27  ;;  %v309_v46 = vsel %vm205_vm4, %v308_v24, %v304_v34 }
  0xa3   :  { %v206_v49 = vsel %vm205_vm4, %v204_v25, %v199_v35 }
  0xa4   :  { %v1043_v36 = vpop.xlane.xlu1 %112  ;;  %v213_v53 = vsel %vm212_vm5, %v211_v29, %v206_v49 }
  0xa5   :  { %v1045_v37 = vpop.xlane.xlu0 %64  ;;  %v318_v32 = vrot.slane %v1043_v36, %v217_v3 }
  0xa6   :  { %v218_v33 = vrot.slane %v1045_v37, %v217_v3  ;;  %v314_v37 = vsel %vm212_vm5, %v313_v28, %v309_v46 }
  0xa7   :  { %v319_v56 = vsel %vm219_vm6, %v318_v32, %v314_v37 }
  0xa8   :  { %v1047_v38 = vpop.xlane.xlu1 %115  ;;  %v220_v57 = vsel %vm219_vm6, %v218_v33, %v213_v53 }
  0xa9   :  { %v1049_v39 = vpop.xlane.xlu0 %67  ;;  %v323_v47 = vrot.slane %v1047_v38, %v224_v6 }
  0xaa   :  { %v225_v48 = vrot.slane %v1049_v39, %v224_v6 }
  0xab   :  { %v324_v58 = vsel %vm226_vm7, %v323_v47, %v319_v56 }
  0xac   :  { %v1051_v40 = vpop.xlane.xlu1 %118  ;;  %v227_v59 = vsel %vm226_vm7, %v225_v48, %v220_v57 }
  0xad   :  { %v1053_v41 = vpop.xlane.xlu0 %70  ;;  %v328_v52 = vrot.slane %v1051_v40, %v231_v7 }
  0xae   :  { %v232_v36 = vrot.slane %v1053_v41, %v231_v7 }
  0xaf   :  { %v329_v60 = vsel %vm233_vm8, %v328_v52, %v324_v58 }
  0xb0   :  { %v1055_v43 = vpop.xlane.xlu1 %121  ;;  %v234_v61 = vsel %vm233_vm8, %v232_v36, %v227_v59 }
  0xb1   :  { %v1057_v44 = vpop.xlane.xlu0 %73  ;;  %v333_v54 = vrot.slane %v1055_v43, %v1067_v8 }
  0xb2   :  { %v239_v38 = vrot.slane %v1057_v44, %v1067_v8 }
  0xb3   :  { %v334_v0 = vsel %vm240_vm9, %v333_v54, %v329_v60 }
  0xb4   :  { %v1059_v50 = vpop.xlane.xlu1 %124  ;;  %v241_v1 = vsel %vm240_vm9, %v239_v38, %v234_v61 }
  0xb5   :  { %v1061_v51 = vpop.xlane.xlu0 %76  ;;  %v338_v40 = vrot.slane %v1059_v50, %v1069_v9 }
  0xb6   :  { %v246_v41 = vrot.slane %v1061_v51, %v1069_v9 }
  0xb7   :  { %v339_v4 = vsel %vm247_vm10, %v338_v40, %v334_v0 }
  0xb8   :  { %v1063_v62 = vpop.xlane.xlu1 %127  ;;  %v248_v5 = vsel %vm247_vm10, %v246_v41, %v241_v1 }
  0xb9   :  { %v1065_v63 = vpop.xlane.xlu0 %79  ;;  %v343_v43 = vrot.slane %v1063_v62, %v1077_v16 }
  0xba   :  { %v253_v44 = vrot.slane %v1065_v63, %v1077_v16 }
  0xbb   :  { %v344_v8 = vsel %vm254_vm11, %v343_v43, %v339_v4 }
  0xbc   :  { %v1071_v10 = vpop.xlane.xlu1 %130  ;;  %v255_v9 = vsel %vm254_vm11, %v253_v44, %v248_v5 }
  0xbd   :  { %v1073_v11 = vpop.xlane.xlu0 %82  ;;  %v348_v50 = vrot.slane %v1071_v10, %v1079_v17 }
  0xbe   :  { %v260_v51 = vrot.slane %v1073_v11, %v1079_v17 }
  0xbf   :  { %v349_v12 = vsel %vm261_vm12, %v348_v50, %v344_v8 }
  0xc0   :  { %v134_v30 = vpop.xlane.xlu1 %133  ;;  %v262_v13 = vsel %vm261_vm12, %v260_v51, %v255_v9 }
  0xc1   :  { %v86_v31 = vpop.xlane.xlu0 %85  ;;  %v353_v2 = vrot.slane %v134_v30, %v1083_v20  ;;  %v718_v30 = vld [vmem:[%s1170_s2] ss:$0 sm:$0xff] }
  0xc2   :  { %v267_v62 = vrot.slane %v86_v31, %v1083_v20 }
  0xc3   :  { %v354_v14 = vsel %vm268_vm13, %v353_v2, %v349_v12 }
  0xc4   :  { %v137_v39 = vpop.xlane.xlu1 %136  ;;  %v269_v15 = vsel %vm268_vm13, %v267_v62, %v262_v13 }
  0xc5   :  { %v89_v55 = vpop.xlane.xlu0 %88  ;;  %v358_v6 = vrot.slane %v137_v39, %v1085_v21 }
  0xc6   :  { %v274_v7 = vrot.slane %v89_v55, %v1085_v21 }
  0xc7   :  { %v359_v18 = vsel %vm275_vm14, %v358_v6, %v354_v14 }
  0xc8   :  { %v140_v3 = vpop.xlane.xlu1 %139  ;;  %v276_v19 = vsel %vm275_vm14, %v274_v7, %v269_v15 }
  0xc9   :  { %v92_v63 = vpop.xlane.xlu0 %91  ;;  %v363_v10 = vrot.slane %v140_v3, %v1093_v42 }
  0xca   :  { %v281_v11 = vrot.slane %v92_v63, %v1093_v42 }
  0xcb   :  { %v364_v22 = vsel %vm282_vm15, %v363_v10, %v359_v18 }
  0xcc   :  { %v143_v16 = vpop.xlane.xlu1 %142  ;;  %v283_v23 = vsel %vm282_vm15, %v281_v11, %v276_v19 }
  0xcd   :  { %v95_v17 = vpop.xlane.xlu0 %94  ;;  %v368_v20 = vrot.slane %v143_v16, %v1095_v45 }
  0xce   :  { %v288_v21 = vrot.slane %v95_v17, %v1095_v45 }
  0xcf   :  { %v369_v24 = vsel %vm289_vm0, %v368_v20, %v364_v22 }
  0xd0   :  { %v290_v25 = vsel %vm289_vm0, %v288_v21, %v283_v23 }
  0xd1   :  { %v371_v28 = vsel %vm370_vm1, %v369_v24, %v290_v25 }
  0xd2   :  { %373 = vst [vmem:[#allocation2] sm:$0x3] %v371_v28 }
  0xd9   :  { %v609_v29 = vld [vmem:[#allocation2] sm:$0x3] }
  0xda   :  { %769 = vmatmul.mubr.f32.vlgmr.msra.gmra.mrb[0].mxu0 %v609_v29 }
 0x1ad   :  { %v699_v31 = vpop.f32.mrb[0].mxu0 }
 0x1ae   :  { %v700_v42 = vadd.f32 %v718_v30, %v699_v31  ;;  %v770_v26 = vpop.f32.mrb[1].mxu0 }
 0x1b0   :  { %703 = vst [vmem:[#allocation3] sm:$0x3] %v700_v42 }
 0x1b1   :  { %810 = shalt.err (!%p807_p4)
}
 0x1b2   :  { %s811_s4 = scalar_lea.hbm %s1171_s3, 32 }
 0x1b3   :  { %p812_p5 = scmp.ne.s32.totalorder %s1171_s3, %s811_s4  ;;  %p815_p6 = scmp.lt.u32.totalorder %s811_s4, %s1171_s3 }
 0x1b5   :  { %p817_p7 = pnand %p815_p6, %p812_p5 }
 0x1b7   :  { %820 = shalt.err (!%p817_p7)
}
 0x1b8   :  { %713 = dma.vmem_to_hbm [thread:$0]  %s711_s28, 32, %s1171_s3, [#allocation4]  }
 0x1b9   :  { %821 = dma.done.wait [#allocation4], 32  }
 0x1ba   :  { %822 = vsyncadd [#allocation4], 4294967264 }
 0x1bb   :  { %717 = vsyncpa [#allocation4], 1 }

</bundles_post_ra>
